<compile_context>
chip_gen: v7x
topology: tpu7x:2x2x1
jax: 0.10.0
libtpu: 0.0.40
codegen_flags: <defaults>
</compile_context>

<pallas_src>
import functools

import jax
import jax.numpy as jnp
from jax import lax
from jax.experimental import pallas as pl
from jax.experimental.pallas import tpu as pltpu


def _cam_kernel(gamma_ref, x_ref, out_ref, *, mxu_bf16):
    # gamma_ref : SMEM ref, shape (1,), float32
    # x_ref     : VMEM block (bt, C, n_pad), native dtype
    # out_ref   : VMEM block (bt, C, n_pad)
    x = x_ref[...]
    xm = x.astype(jnp.bfloat16) if mxu_bf16 else x

    # energy[b, i, j] = sum_n x[b, i, n] * x[b, j, n]
    # Contract the last dims of both operands directly (batched) so no
    # transposed copy of the slab is materialized.
    energy = lax.dot_general(
        xm, xm,
        dimension_numbers=(((2,), (2,)), ((0,), (0,))),
        preferred_element_type=jnp.float32,
    )                                                    # (bt, C, C) f32

    # PyTorch: attention = softmax(rowmax(E) - E). Softmax is shift-invariant,
    # so the stabilized equivalent is exp(rowmin(E) - E) / sum (exponents <= 0).
    e_min = jnp.min(energy, axis=-1, keepdims=True)      # (bt, C, 1)
    p = jnp.exp(e_min - energy)                          # (bt, C, C)
    denom = jnp.sum(p, axis=-1, keepdims=True)           # (bt, C, 1)

    # Fold gamma into the tiny C x C attention instead of scaling the full
    # (bt, C, N) output slab:  gamma * (A @ x) == (gamma * A) @ x.
    gamma = gamma_ref[0]
    attention = (p * gamma) / denom                      # exact divide, f32

    # out[b, c, n] = sum_d attention[b, c, d] * x[b, d, n]
    out = lax.dot_general(
        attention.astype(xm.dtype), xm,
        dimension_numbers=(((2,), (1,)), ((0,), (0,))),
        preferred_element_type=jnp.float32,
    )                                                    # (bt, C, n_pad) f32

    out_ref[...] = (out + x.astype(jnp.float32)).astype(out_ref.dtype)


def _round_up(v, m):
    return ((v + m - 1) // m) * m


def _vmem_capacity_bytes():
    """Physical VMEM of the attached chip; conservative 64 MiB fallback
    (valid on v5e/v6e/v7x) if the query is unavailable."""
    try:
        info = pltpu.get_tpu_info()
        cap = getattr(info, "vmem_capacity_bytes", None)
        if cap:
            return int(cap)
    except Exception:
        pass
    return 64 << 20


_SUBLANE = {4: 8, 2: 16, 1: 32}


def _per_batch_vmem_bytes(C, n_pad, itemsize, mxu_bf16):
    """Resident VMEM per batch element, including sublane/lane padding,
    double-buffered input/output slabs, f32 temporaries and bf16 copies."""
    sub = _SUBLANE.get(itemsize, 8)
    slab_native = _round_up(C, sub) * n_pad * itemsize        # x / out blocks
    slab_f32 = _round_up(C, 8) * n_pad * 4                    # f32 MXU output
    n_f32_slabs = 1 + (0 if itemsize == 4 else 1)             # + x promoted in epilogue
    slab_bf16 = _round_up(C, 16) * n_pad * 2 if (mxu_bf16 and itemsize == 4) else 0
    cc = _round_up(C, 8) * _round_up(C, 128) * 4              # one C x C f32 temp
    # 2 slabs (in+out) x double-buffering, ~3 live C x C temps (energy/p/attn)
    return 4 * slab_native + n_f32_slabs * slab_f32 + 2 * slab_bf16 + 3 * cc


def _pick_batch_tile(B, per_batch_bytes, vmem_cap):
    """Fold batch elements per grid step for small C (amortizes per-step
    overhead / tiny matmuls); keep >= 2 grid steps when slabs are big enough
    that splitting the batch axis across TensorCores matters."""
    if B <= 1:
        return 1
    budget = max(vmem_cap // 3, 4 << 20)
    max_bt = max(1, min(B, budget // max(per_batch_bytes, 1)))
    if per_batch_bytes >= (1 << 20):
        max_bt = min(max_bt, max(1, B // 2))
    bt = 1
    for d in range(1, int(max_bt) + 1):                  # largest divisor of B
        if B % d == 0:
            bt = d
    return bt


def cam_module_forward(x, gamma):
    """x: (B, C, H, W), gamma: (1,) float32 -> (B, C, H, W)."""
    B, C, H, W = x.shape
    N = H * W
    n_pad = _round_up(N, 128)                            # lane-dense slab

    x_flat = x.reshape(B, C, N)
    if n_pad != N:
        x_flat = jnp.pad(x_flat, ((0, 0), (0, 0), (0, n_pad - N)))

    itemsize = jnp.dtype(x.dtype).itemsize
    # Feed the MXU in bf16 (f32 accumulation) only when C is large enough to
    # be compute-bound; small-C shapes stay in full f32.
    mxu_bf16 = (x.dtype == jnp.float32) and (C >= 256)

    vmem_cap = _vmem_capacity_bytes()
    per_b = _per_batch_vmem_bytes(C, n_pad, itemsize, mxu_bf16)
    bt = _pick_batch_tile(B, per_b, vmem_cap)

    needed = bt * per_b + (2 << 20)
    vmem_limit = int(min(max(needed, 16 << 20), vmem_cap))

    gamma = jnp.asarray(gamma, jnp.float32).reshape((1,))
    kernel = functools.partial(_cam_kernel, mxu_bf16=mxu_bf16)

    out_flat = pl.pallas_call(
        kernel,
        out_shape=jax.ShapeDtypeStruct((B, C, n_pad), x.dtype),
        grid=(B // bt,),
        in_specs=[
            pl.BlockSpec(memory_space=pltpu.MemorySpace.SMEM),       # gamma
            pl.BlockSpec((bt, C, n_pad), lambda i: (i, 0, 0)),       # x slab
        ],
        out_specs=pl.BlockSpec((bt, C, n_pad), lambda i: (i, 0, 0)),
        compiler_params=pltpu.CompilerParams(
            dimension_semantics=("parallel",),
            vmem_limit_bytes=vmem_limit,
        ),
    )(gamma, x_flat)

    if n_pad != N:
        out_flat = out_flat[:, :, :N]
    return out_flat.reshape(B, C, H, W)


def cam_module_reference(x, gamma):
    """Pure-JAX reference mirroring the PyTorch forward exactly."""
    B, C, H, W = x.shape
    xf = x.reshape(B, C, H * W)
    energy = jnp.einsum("bcn,bdn->bcd", xf, xf)
    energy_new = jnp.max(energy, axis=-1, keepdims=True) - energy
    attention = jax.nn.softmax(energy_new, axis=-1)
    out = jnp.einsum("bcd,bdn->bcn", attention, xf).reshape(B, C, H, W)
    return gamma[0] * out + x


if __name__ == "__main__":
    key = jax.random.PRNGKey(0)
    B, C, H, W = 2, 4, 16, 16
    x = jax.random.normal(key, (B, C, H, W), dtype=jnp.float32)

    # Parameter init as in PyTorch __init__: gamma = zeros(1); also test a
    # nonzero gamma so the attention path is actually exercised.
    gamma_zero = jnp.zeros((1,), dtype=jnp.float32)
    gamma_test = jnp.asarray([0.5], dtype=jnp.float32)

    # gamma = 0: output must equal the input (exact residual path).
    out0 = jax.block_until_ready(cam_module_forward(x, gamma_zero))
    ref0 = cam_module_reference(x, gamma_zero)
    assert jnp.allclose(out0, ref0, atol=1e-5, rtol=1e-5)

    # nonzero gamma: softmax is now exact (divide, no approx reciprocal); the
    # tolerance only needs to cover the stabilized-softmax reformulation and
    # TPU f32 matmul / exp rounding.
    out1 = jax.block_until_ready(cam_module_forward(x, gamma_test))
    ref1 = cam_module_reference(x, gamma_test)
    assert jnp.allclose(out1, ref1, atol=2e-3, rtol=2e-3)

    # second shape exercises batch folding (bt > 1) and the N-padding path
    # (8*8 = 64 -> padded to 128 lanes).
    x2 = jax.random.normal(jax.random.PRNGKey(1), (4, 4, 8, 8), dtype=jnp.float32)
    out2 = jax.block_until_ready(cam_module_forward(x2, gamma_test))
    ref2 = cam_module_reference(x2, gamma_test)
    assert jnp.allclose(out2, ref2, atol=2e-3, rtol=2e-3)

    print("KERNEL_OK")
</pallas_src>

<mosaic_0001>
module attributes {stable_mosaic.version = 11 : i64} {
  func.func @_cam_kernel(%arg0: i32, %arg1: memref<1xf32, #tpu.memory_space<smem>>, %arg2: memref<2x4x256xf32, #tpu.memory_space<vmem>>, %arg3: memref<2x4x256xf32, #tpu.memory_space<vmem>>) attributes {dimension_semantics = [#tpu.dimension_semantics<parallel>], iteration_bounds = array<i64: 1>, scalar_prefetch = 0 : i64, scratch_operands = 0 : i64, tpu.core_type = #tpu.core_type<tc>, window_params = [{transform_indices = @transform_0, window_bounds = array<i64: 1>}, {transform_indices = @transform_1, window_bounds = array<i64: 2, 4, 256>}, {transform_indices = @transform_2, window_bounds = array<i64: 2, 4, 256>}]} {
    %c0 = arith.constant 0 : index
    %c0_0 = arith.constant 0 : index
    %c0_1 = arith.constant 0 : index
    %0 = vector.load %arg2[%c0, %c0_0, %c0_1] : memref<2x4x256xf32, #tpu.memory_space<vmem>>, vector<2x4x256xf32>
    %cst = arith.constant dense<0.000000e+00> : vector<2x4x4xf32>
    %1 = tpu.matmul %0, %0, %cst {dimension_numbers = #tpu.dot_dimension_numbers<[2], [2], [1], [1], [0, 0, 0, 1, 1, 1], [0], [0]>} : vector<2x4x256xf32>, vector<2x4x256xf32>, vector<2x4x4xf32> -> vector<2x4x4xf32>
    %cst_2 = arith.constant dense<0x7F800000> : vector<2x4xf32>
    %2 = vector.multi_reduction <minimumf>, %1, %cst_2 [2] : vector<2x4x4xf32> to vector<2x4xf32>
    %3 = vector.shape_cast %2 : vector<2x4xf32> to vector<2x4x1xf32>
    %4 = vector.broadcast %3 : vector<2x4x1xf32> to vector<2x4x4xf32>
    %5 = arith.subf %4, %1 : vector<2x4x4xf32>
    %6 = math.exp %5 : vector<2x4x4xf32>
    %cst_3 = arith.constant dense<0.000000e+00> : vector<2x4xf32>
    %7 = vector.multi_reduction <add>, %6, %cst_3 [2] : vector<2x4x4xf32> to vector<2x4xf32>
    %8 = vector.shape_cast %7 : vector<2x4xf32> to vector<2x4x1xf32>
    %c0_4 = arith.constant 0 : index
    %9 = memref.load %arg1[%c0_4] : memref<1xf32, #tpu.memory_space<smem>>
    %10 = vector.broadcast %9 : f32 to vector<2x4x4xf32>
    %11 = arith.mulf %6, %10 : vector<2x4x4xf32>
    %12 = vector.broadcast %8 : vector<2x4x1xf32> to vector<2x4x4xf32>
    %13 = arith.divf %11, %12 : vector<2x4x4xf32>
    %cst_5 = arith.constant dense<0.000000e+00> : vector<2x4x256xf32>
    %14 = tpu.matmul %13, %0, %cst_5 {dimension_numbers = #tpu.dot_dimension_numbers<[2], [1], [1], [2], [0, 0, 0, 1, 1, 2], [0], [0]>} : vector<2x4x4xf32>, vector<2x4x256xf32>, vector<2x4x256xf32> -> vector<2x4x256xf32>
    %15 = arith.addf %14, %0 : vector<2x4x256xf32>
    %c0_6 = arith.constant 0 : index
    %c0_7 = arith.constant 0 : index
    %c0_8 = arith.constant 0 : index
    %16 = vector.load %arg3[%c0_6, %c0_7, %c0_8] : memref<2x4x256xf32, #tpu.memory_space<vmem>>, vector<2x4x256xf32>
    tpu.vector_store %arg3[%c0_6, %c0_7, %c0_8], %15 {strides = array<i32>} : memref<2x4x256xf32, #tpu.memory_space<vmem>>, vector<2x4x256xf32>,
    return
  }
  func.func @transform_0(%arg0: i32) -> i32 {
    %c0_i32 = arith.constant 0 : i32
    %c0_i32_0 = arith.constant 0 : i32
    return %c0_i32 : i32
  }
  func.func @transform_1(%arg0: i32) -> (i32, i32, i32) {
    %c0_i32 = arith.constant 0 : i32
    %c0_i32_0 = arith.constant 0 : i32
    %c0_i32_1 = arith.constant 0 : i32
    return %arg0, %c0_i32, %c0_i32_0 : i32, i32, i32
  }
  func.func @transform_2(%arg0: i32) -> (i32, i32, i32) {
    %c0_i32 = arith.constant 0 : i32
    %c0_i32_0 = arith.constant 0 : i32
    %c0_i32_1 = arith.constant 0 : i32
    return %arg0, %c0_i32, %c0_i32_0 : i32, i32, i32
  }
}

</mosaic_0001>

<bundles_post_ra>
// kernel: tpu_custom_call.1
= control target key start
LH: loop header
LB: loop body
LE: loop exit
PB: predicated region body
PF: predicated region fallthrough
CT: control target
= control target key end

     0   :  { %8 = vsyncpa [#allocation4], 0  ;;  %s519_s0 = inlined_call_operand.<no memory space> [shape: f32[1], index: 0, kind: input, shape index: {}]   ;;  %s520_s1 = inlined_call_operand.hbm [shape: f32[2,4,256], index: 1, kind: input, shape index: {}]   ;;  %s521_s2 = inlined_call_operand.hbm [shape: f32[2,4,256], index: 2, kind: output, shape index: {}]  }
   0x1   :  { %9 = vsyncpa [#allocation5], 0  ;;  %s456_s9 = smov [#allocation3]   ;;  %s408_s13 = scalar_lea.hbm %s520_s1, 256 }
   0x2   :  { %s17_s10 = sshll.u32 %s456_s9, 4  ;;  %p409_p0 = scmp.ne.s32.totalorder %s520_s1, %s408_s13  ;;  %s18_s10 = int_to_ptr.vmem [resolvable:$true] %s17_s10 }
   0x3   :  { %p412_p1 = scmp.lt.u32.totalorder %s408_s13, %s520_s1 }
   0x5   :  { %p414_p2 = pnand %p412_p1, %p409_p0 }
   0x7   :  { %417 = shalt.err (!%p414_p2)
}
   0x8   :  { %s418_s18 = scalar_lea.vmem %s18_s10, 256  ;;  %p423_p4 = scmp.lt.s32.totalorder %s18_s10, %s18_s10 }
   0x9   :  { %p419_p3 = scmp.ne.s32.totalorder %s18_s10, %s418_s18  ;;  %p424_p5 = scmp.lt.s32.totalorder %s418_s18, %s418_s18 }
   0xb   :  { %p425_p6 = por %p424_p5, %p423_p4 }
   0xd   :  { %p426_p7 = pnand %p425_p6, %p419_p3 }
   0xf   :  { %429 = shalt.err (!%p426_p7)
}
  0x10   :  { %s457_s19 = smov 128   ;;  %s458_s20 = smov 8  }
  0x11   :  { %23 = dma.hbm_to_vmem [thread:$0]  %s520_s1, 256, %s18_s10, [#allocation4], %s457_s19, %s457_s19, %s458_s20  }
  0x12   :  { %452 = dma.done.wait [#allocation4], 256  }
  0x13   :  { %453 = vsyncadd [#allocation4], 4294967040  ;;  %v27_v0 = vld [vmem:[#allocation3] sm:$0xff]  ;;  %v28_v1 = vld [vmem:[#allocation3 + $0x8] sm:$0xff]  ;;  %vm175_vm0 = vcmask 27648   ;;  %vm206_vm1 = vcmask 1043456   ;;  %v195_v23 = vstv %s519_s0 }
  0x14   :  { %v30_v2 = vcombine.high %v27_v0, %v27_v0  ;;  %v491_v3 = vcombine.high %v28_v1, %v28_v1  ;;  %v459_v20 = vmov 0.0   ;;  %vm202_vm2 = vcmask 31744   ;;  %s460_s24 = smov [#allocation6]  }
  0x15   :  { %s375_s25 = sshll.u32 %s460_s24, 4  ;;  %s376_s25 = int_to_ptr.vmem [resolvable:$true] %s375_s25 }
  0x16   :  { %32 = vmatprep.subr.mxu0 %v30_v2  ;;  %96 = vmatprep.mubr.f32.mxu0 %v30_v2  ;;  %s430_s0 = scalar_lea.vmem %s376_s25, 256  ;;  %p435_p9 = scmp.lt.s32.totalorder %s376_s25, %s376_s25 }
  0x17   :  { %33 = vmatpush1.xpose.msra.mxu0 %v27_v0  ;;  %105 = vmatprep.subr.mxu1 %v491_v3  ;;  %p431_p8 = scmp.ne.s32.totalorder %s376_s25, %s430_s0  ;;  %p436_p10 = scmp.lt.s32.totalorder %s430_s0, %s430_s0 }
  0x18   :  { %106 = vmatpush1.xpose.msra.mxu1 %v28_v1  ;;  %169 = vmatprep.mubr.f32.mxu1 %v491_v3 }
  0x19   :  { %387 = vmatprep.subr.msk.mxu0 %vm206_vm1, %v30_v2  ;;  %390 = vmatprep.subr.msk.mxu1 %vm206_vm1, %v491_v3  ;;  %p437_p11 = por %p436_p10, %p435_p9 }
  0x1a   :  { %97 = vmatmul.mubr.f32.vlgmr.msra.gmra.mrb[0].mxu0 %v27_v0 }
  0x1b   :  { %170 = vmatmul.mubr.f32.vlgmr.msra.gmra.mrb[0].mxu1 %v28_v1  ;;  %388 = vmatpush1.msk.msra.mxu0 %vm206_vm1, %v27_v0  ;;  %p438_p12 = pnand %p437_p11, %p431_p8 }
  0x1c   :  { %275 = vmatprep.mubr.f32.mxu0 %v459_v20  ;;  %391 = vmatpush1.msk.msra.mxu1 %vm206_vm1, %v28_v1 }
  0x1d   :  { %353 = vmatprep.mubr.f32.mxu1 %v459_v20 }
  0xed   :  { %v98_v4 = vpop.f32.mrb[0].mxu0 }
  0xee   :  { %v100_v5 = vpop.f32.mrb[1].mxu0  ;;  %v176_v6 = vsel %vm175_vm0, %v98_v4, inf  ;;  %v171_v7 = vpop.f32.mrb[0].mxu1 }
  0xef   :  { %177 = vmin.xlane.f32.xlu0 %v176_v6  ;;  %v173_v8 = vpop.f32.mrb[1].mxu1  ;;  %v179_v9 = vsel %vm175_vm0, %v171_v7, inf }
  0xf3   :  { %180 = vmin.xlane.f32.xlu0 %v179_v9 }
 0x17c   :  { %v178_v10 = vpop.xlane.xlu0 %177 }
 0x17d   :  { %v182_v11 = vsub.f32 %v178_v10, %v98_v4 }
 0x17f   :  { %v184_v12 = vmul.f32 1.442695, %v182_v11 }
 0x180   :  { %v181_v13 = vpop.xlane.xlu0 %180 }
 0x181   :  { %400 = vpow2.f32 %v184_v12  ;;  %v183_v14 = vsub.f32 %v181_v13, %v171_v7 }
 0x183   :  { %v186_v15 = vmul.f32 1.442695, %v183_v14 }
 0x185   :  { %402 = vpow2.f32 %v186_v15 }
 0x18b   :  { %v401_v16 = vpop.eup %400 }
 0x18c   :  { %v188_v17 = vsel %vm175_vm0, %v401_v16, 0.0  ;;  %v196_v24 = vmul.f32 %v401_v16, %v195_v23 }
 0x18d   :  { %189 = vadd.xlane.f32.xlu1 %v188_v17 }
 0x18f   :  { %v403_v18 = vpop.eup %402 }
 0x190   :  { %v191_v19 = vsel %vm175_vm0, %v403_v18, 0.0  ;;  %v197_v27 = vmul.f32 %v403_v18, %v195_v23 }
 0x191   :  { %192 = vadd.xlane.f32.xlu1 %v191_v19 }
 0x21a   :  { %v190_v21 = vpop.xlane.xlu1 %189 }
 0x21b   :  { %404 = vrcp.f32 %v190_v21 }
 0x21e   :  { %v193_v22 = vpop.xlane.xlu1 %192 }
 0x21f   :  { %406 = vrcp.f32 %v193_v22 }
 0x225   :  { %v405_v25 = vpop.eup %404 }
 0x226   :  { %v199_v26 = vmul.f32 %v405_v25, %v196_v24 }
 0x228   :  { %389 = vmatmul.mubr.msk.f32.vlgmr.msra.gmra.mrb[2].mxu0 %vm202_vm2, %v199_v26 }
 0x229   :  { %v407_v28 = vpop.eup %406 }
 0x22a   :  { %v201_v29 = vmul.f32 %v407_v28, %v197_v27 }
 0x22c   :  { %392 = vmatmul.mubr.msk.f32.vlgmr.msra.gmra.mrb[2].mxu1 %vm202_vm2, %v201_v29 }
 0x2fb   :  { %v277_v30 = vpop.f32.mrb[2].mxu0 }
 0x2fc   :  { %v278_v31 = vadd.f32 %v277_v30, %v27_v0  ;;  %v279_v32 = vpop.f32.mrb[3].mxu0 }
 0x2fd   :  { %v280_v33 = vadd.f32 %v279_v32, %v30_v2 }
 0x2ff   :  { %v364_v34 = vcombine.low %v278_v31, %v280_v33  ;;  %v355_v35 = vpop.f32.mrb[2].mxu1 }
 0x300   :  { %v356_v36 = vadd.f32 %v355_v35, %v28_v1  ;;  %v357_v37 = vpop.f32.mrb[3].mxu1 }
 0x301   :  { %368 = vst [vmem:[#allocation6] sm:$0xff] %v364_v34  ;;  %v358_v38 = vadd.f32 %v357_v37, %v491_v3 }
 0x303   :  { %v365_v39 = vcombine.low %v356_v36, %v358_v38 }
 0x305   :  { %369 = vst [vmem:[#allocation6 + $0x8] sm:$0xff] %v365_v39 }
 0x306   :  { %441 = shalt.err (!%p438_p12)
}
 0x307   :  { %s442_s28 = scalar_lea.hbm %s521_s2, 256 }
 0x308   :  { %p443_p13 = scmp.ne.s32.totalorder %s521_s2, %s442_s28  ;;  %p446_p0 = scmp.lt.u32.totalorder %s442_s28, %s521_s2 }
 0x30a   :  { %p448_p1 = pnand %p446_p0, %p443_p13 }
 0x30c   :  { %451 = shalt.err (!%p448_p1)
}
 0x30d   :  { %381 = dma.vmem_to_hbm [thread:$0]  %s376_s25, 256, %s521_s2, [#allocation5], %s457_s19, %s457_s19, %s458_s20  }
 0x30e   :  { %454 = dma.done.wait [#allocation5], 256  }
 0x30f   :  { %455 = vsyncadd [#allocation5], 4294967040 }
 0x310   :  { %385 = vsyncpa [#allocation4], 1 }
 0x311   :  { %386 = vsyncpa [#allocation5], 1 }

</bundles_post_ra>
